<compile_context>
chip_gen: v5e
topology: v5e:2x2
jax: 0.10.0
libtpu: 0.0.40
codegen_flags: <defaults>
</compile_context>

<pallas_src>
import math
import numpy as np
import jax
import jax.numpy as jnp
from jax.experimental import pallas as pl
from jax.experimental.pallas import tpu as pltpu


T_GRID = 100  # t = linspace(0.01, 1, 100) in get_conditionals_per_latent


def _round_up(x, m):
    return ((x + m - 1) // m) * m


# ---------------------------------------------------------------------------
# Kernel
# ---------------------------------------------------------------------------

def make_csid_kernel(ndims: int):
    def kernel(bT_ref, aT_ref, c_ref, f_ref, out_ref):
        # bT_ref : (N, 2S_pad, tb)  basis (real|imag stacked on sublanes), batch on lanes
        # aT_ref : (N, F, 2S_pad)   [Ar ; -Ai]^T per latent        (grid-invariant)
        # c_ref  : (N, F, 1)        hoisted normalization constants (grid-invariant)
        # f_ref  : (F, 1)           final mixing weights            (grid-invariant)
        # out_ref: (1, tb)          lane-dense output row
        res = None
        for n in range(ndims):
            # (F, tb) = (F, 2S_pad) @ (2S_pad, tb): one small MXU push per latent,
            # no block-diagonal zero MACs.  Zero-padded K rows/cols contribute 0.
            r = jnp.dot(aT_ref[n], bT_ref[n],
                        preferred_element_type=jnp.float32)
            # relu + per-latent normalization (relu(x) * c: no sign assumption on c)
            r = jnp.maximum(r, 0.0) * c_ref[n]
            res = r if res is None else res * r
        # f-weighted sum over the F rank-1 components: sublane reduce (XLU),
        # emitted as an unmasked lane-dense (1, tb) store.
        out_ref[...] = jnp.sum(res * f_ref[...], axis=0, keepdims=True)
    return kernel


# ---------------------------------------------------------------------------
# Wrapper: operand packing (hoisted, reusable) + pallas_call runner
# ---------------------------------------------------------------------------

def csid_prepare(Br, Bi, Ar, Ai, Tr, Ti, f, *, dt, matmul_dtype=jnp.float32):
    """Pack the operands once (hoist out of the per-call path when factors are reused).

    Br/Bi: (N, B, S) real/imag of basis^T; Ar/Ai: (N, S, F) augmented factors;
    Tr/Ti: (T, S) t-grid basis; f: (F, 1).
    Returns (BT, AT, c, f_col) for csid_forward_packed.
    """
    N, B, S = Br.shape
    F = Ar.shape[-1]
    S2 = 2 * S
    S2p = _round_up(S2, 8)            # pad contraction axis to a sublane multiple

    # grid-invariant normalization constants (== get_conditionals_per_latent):
    # relu(Re(bb1^T @ aug_fac)), trapezoid over the uniform t grid, reciprocal.
    proj = jnp.maximum(
        jnp.einsum('ts,nsf->ntf', Tr, Ar) - jnp.einsum('ts,nsf->ntf', Ti, Ai),
        0.0)                                                          # (N, T, F)
    trap = dt * (proj.sum(axis=1) - 0.5 * (proj[:, 0] + proj[:, -1]))  # (N, F)
    c = (1.0 / trap).reshape(N, F, 1).astype(jnp.float32)

    # AT[n] = [Ar[n]; -Ai[n]]^T  -> (N, F, 2S), zero-padded on K to S2p
    AT = jnp.transpose(jnp.concatenate([Ar, -Ai], axis=1), (0, 2, 1))
    AT = jnp.pad(AT, ((0, 0), (0, 0), (0, S2p - S2)))

    # BT[n] = [Br[n]^T ; Bi[n]^T] -> (N, 2S, B): batch rides the lane axis
    BT = jnp.concatenate(
        [jnp.transpose(Br, (0, 2, 1)), jnp.transpose(Bi, (0, 2, 1))], axis=1)
    BT = jnp.pad(BT, ((0, 0), (0, S2p - S2), (0, 0)))

    if matmul_dtype != jnp.float32:
        # Halves the dominant HBM stream on every generation (v5e/v6e/v7x MXUs all
        # take bf16); accumulation stays f32 via preferred_element_type.  Opt-in:
        # bf16 rounding amplified by the product over latents can exceed 1e-3.
        BT = BT.astype(matmul_dtype)
        AT = AT.astype(matmul_dtype)

    f_col = jnp.reshape(f, (F, 1)).astype(jnp.float32)
    return BT, AT, c, f_col


def _choose_batch_tile(B):
    # HBM/per-step-overhead bound -> big lane tiles.  When tiled (tb < B) the
    # tile is a multiple of 128 lanes; for B > 256 we always take >= 2 grid
    # steps so both v7x TensorCores get work (neutral on 1-TC v5e/v6e).
    if B <= 256:
        return B                      # tiny problem: single step, full batch
    half = _round_up(-(-B // 2), 128)
    return min(4096, half)


def csid_forward_packed(BT, AT, c, f_col, *, batch_tile=None):
    N, S2p, B = BT.shape
    F = AT.shape[1]

    tb = _choose_batch_tile(B) if batch_tile is None else min(batch_tile, B)
    if tb < B:
        tb = _round_up(tb, 128)
    B_pad = _round_up(B, tb)
    if B_pad != B:
        # remainder handling: zero-pad the lane axis, slice the padded outputs off
        BT = jnp.pad(BT, ((0, 0), (0, 0), (0, B_pad - B)))
    grid = B_pad // tb

    # VMEM budget (worst case tb=4096, f32): BT tile = N*S2p*tb*4 B (1 MiB at
    # N=2, S2p=32) per buffer; with 2-3 buffers + tiny AT/c/f this stays far
    # under the 32 MiB scoped default on every generation, including v7x.
    bT_spec = pl.BlockSpec((N, S2p, tb), lambda i: (0, 0, i))
    if grid >= 4:
        # pipeline is essentially pure DMA at this arithmetic intensity: a 3rd
        # buffer hides step boundaries (secondary to the large tiles above).
        bT_spec = pl.BlockSpec((N, S2p, tb), lambda i: (0, 0, i),
                               pipeline_mode=pl.Buffered(3))

    out = pl.pallas_call(
        make_csid_kernel(N),
        out_shape=jax.ShapeDtypeStruct((1, B_pad), jnp.float32),
        grid_spec=pltpu.PrefetchScalarGridSpec(
            num_scalar_prefetch=0,
            grid=(grid,),
            in_specs=[
                bT_spec,                                          # basis stream
                pl.BlockSpec((N, F, S2p), lambda i: (0, 0, 0)),   # AT (invariant)
                pl.BlockSpec((N, F, 1), lambda i: (0, 0, 0)),     # c  (invariant)
                pl.BlockSpec((F, 1), lambda i: (0, 0)),           # f  (invariant)
            ],
            out_specs=pl.BlockSpec((1, tb), lambda i: (0, i)),
        ),
        compiler_params=pltpu.CompilerParams(
            dimension_semantics=("parallel",)),
    )(BT, AT, c, f_col)

    return out[0, :B]


def csid_forward(Br, Bi, Ar, Ai, Tr, Ti, f, *, dt,
                 batch_tile=None, matmul_dtype=jnp.float32):
    """Convenience: pack + run.  For repeated calls with the same factors,
    call csid_prepare once and csid_forward_packed per batch."""
    packed = csid_prepare(Br, Bi, Ar, Ai, Tr, Ti, f, dt=dt,
                          matmul_dtype=matmul_dtype)
    return csid_forward_packed(*packed, batch_tile=batch_tile)


# ---------------------------------------------------------------------------
# Parameter / basis construction (glue, mirrors csid_net.__init__ / get_basis)
# ---------------------------------------------------------------------------

def build_inputs(key, *, ndims=2, F=8, S=15, n_train=32, b_size=16, idx=0):
    assert S % 2 == 1
    K = (S - 1) // 2

    k_r, k_i, k_x = jax.random.split(key, 3)
    # factors[n]: real ~ U(0,1), imag = 0.1 * U(0,1), shape (K, F)
    fac_real = jax.random.uniform(k_r, (ndims, K, F), dtype=jnp.float32)
    fac_imag = 0.1 * jax.random.uniform(k_i, (ndims, K, F), dtype=jnp.float32)

    # augmented conjugate-symmetric factors, shape (ndims, S, F)
    ones_row = jnp.ones((ndims, 1, F), jnp.float32)
    zeros_row = jnp.zeros((ndims, 1, F), jnp.float32)
    Ar = jnp.concatenate([fac_real, ones_row, fac_real[:, ::-1, :]], axis=1)
    Ai = jnp.concatenate([fac_imag, zeros_row, -fac_imag[:, ::-1, :]], axis=1)

    # training data and batch index range
    x_train = jax.random.uniform(k_x, (n_train, ndims), dtype=jnp.float32)
    lo = idx * b_size
    hi = min(lo + b_size, n_train)

    # Fourier basis exp(-i 2 pi k x), k = -K..K ; basis[n] shape (S, M)
    k_vec = jnp.arange(-K, K + 1, dtype=jnp.float32)          # (S,)
    Br_list, Bi_list = [], []
    for n in range(ndims):
        theta = 2.0 * math.pi * jnp.outer(k_vec, x_train[:, n])   # (S, M)
        Br_list.append(jnp.cos(theta).T[lo:hi])     # (B, S) real part of basis^T
        Bi_list.append((-jnp.sin(theta)).T[lo:hi])  # (B, S) imag part
    Br = jnp.stack(Br_list, axis=0)
    Bi = jnp.stack(Bi_list, axis=0)

    # t-grid basis for the conditional-normalization constants, shape (T, S)
    t = jnp.linspace(0.01, 1.0, T_GRID, dtype=jnp.float32)
    theta_t = 2.0 * math.pi * jnp.outer(k_vec, t)             # (S, T)
    Tr = jnp.cos(theta_t).T
    Ti = (-jnp.sin(theta_t)).T
    dt = float((1.0 - 0.01) / (T_GRID - 1))

    # last factor: f_vec = (1/F) * ones(F, 1)  (real)
    f = jnp.ones((F, 1), jnp.float32) / F

    return Br, Bi, Ar, Ai, Tr, Ti, f, dt


def reference_forward(Br, Bi, Ar, Ai, Tr, Ti, f, dt):
    """Pure-JAX reference matching csid_net.forward (state='train')."""
    res = None
    for n in range(Br.shape[0]):
        proj = jnp.maximum(Tr @ Ar[n] - Ti @ Ai[n], 0.0)
        trap = dt * (proj.sum(0) - 0.5 * (proj[0] + proj[-1]))
        c = 1.0 / trap
        r = jnp.maximum(Br[n] @ Ar[n] - Bi[n] @ Ai[n], 0.0) * c[None, :]
        res = r if res is None else res * r
    return (res @ f)[:, 0]


if __name__ == "__main__":
    key = jax.random.PRNGKey(0)
    Br, Bi, Ar, Ai, Tr, Ti, f, dt = build_inputs(
        key, ndims=2, F=8, S=15, n_train=32, b_size=16, idx=0)

    out = csid_forward(Br, Bi, Ar, Ai, Tr, Ti, f, dt=dt)
    out = jax.block_until_ready(out)

    ref = jax.block_until_ready(reference_forward(Br, Bi, Ar, Ai, Tr, Ti, f, dt))
    if not np.allclose(np.asarray(out), np.asarray(ref), rtol=1e-3, atol=1e-3):
        raise AssertionError(f"mismatch:\nkernel={out}\nref={ref}")

    print("KERNEL_OK")
</pallas_src>

<mosaic_0001>
module attributes {stable_mosaic.version = 11 : i64} {
  func.func @kernel(%arg0: i32, %arg1: memref<2x32x16xf32, #tpu.memory_space<vmem>>, %arg2: memref<2x8x32xf32, #tpu.memory_space<vmem>>, %arg3: memref<2x8x1xf32, #tpu.memory_space<vmem>>, %arg4: memref<8x1xf32, #tpu.memory_space<vmem>>, %arg5: memref<1x16xf32, #tpu.memory_space<vmem>>) attributes {dimension_semantics = [#tpu.dimension_semantics<parallel>], iteration_bounds = array<i64: 1>, scalar_prefetch = 0 : i64, scratch_operands = 0 : i64, tpu.core_type = #tpu.core_type<tc>, window_params = [{transform_indices = @transform_0, window_bounds = array<i64: 2, 32, 16>}, {pipeline_mode = #tpu.pipeline_mode<synchronous>, transform_indices = @transform_1, window_bounds = array<i64: 2, 8, 32>}, {pipeline_mode = #tpu.pipeline_mode<synchronous>, transform_indices = @transform_2, window_bounds = array<i64: 2, 8, 1>}, {pipeline_mode = #tpu.pipeline_mode<synchronous>, transform_indices = @transform_3, window_bounds = array<i64: 8, 1>}, {transform_indices = @transform_4, window_bounds = array<i64: 1, 16>}]} {
    %c0 = arith.constant 0 : index
    %c0_0 = arith.constant 0 : index
    %c0_1 = arith.constant 0 : index
    %0 = vector.load %arg2[%c0, %c0_0, %c0_1] : memref<2x8x32xf32, #tpu.memory_space<vmem>>, vector<1x8x32xf32>
    %1 = vector.shape_cast %0 : vector<1x8x32xf32> to vector<8x32xf32>
    %c0_2 = arith.constant 0 : index
    %c0_3 = arith.constant 0 : index
    %c0_4 = arith.constant 0 : index
    %2 = vector.load %arg1[%c0_2, %c0_3, %c0_4] : memref<2x32x16xf32, #tpu.memory_space<vmem>>, vector<1x32x16xf32>
    %3 = vector.shape_cast %2 : vector<1x32x16xf32> to vector<32x16xf32>
    %cst = arith.constant dense<0.000000e+00> : vector<8x16xf32>
    %4 = tpu.matmul %1, %3, %cst {dimension_numbers = #tpu.dot_dimension_numbers<[1], [0], [0], [1], [0, 0, 1, 1], [], []>} : vector<8x32xf32>, vector<32x16xf32>, vector<8x16xf32> -> vector<8x16xf32>
    %cst_5 = arith.constant 0.000000e+00 : f32
    %5 = vector.broadcast %cst_5 : f32 to vector<8x16xf32>
    %6 = arith.maximumf %4, %5 : vector<8x16xf32>
    %c0_6 = arith.constant 0 : index
    %c0_7 = arith.constant 0 : index
    %c0_8 = arith.constant 0 : index
    %7 = vector.load %arg3[%c0_6, %c0_7, %c0_8] : memref<2x8x1xf32, #tpu.memory_space<vmem>>, vector<1x8x1xf32>
    %8 = vector.shape_cast %7 : vector<1x8x1xf32> to vector<8x1xf32>
    %9 = vector.broadcast %8 : vector<8x1xf32> to vector<8x16xf32>
    %10 = arith.mulf %6, %9 : vector<8x16xf32>
    %c1 = arith.constant 1 : index
    %c0_9 = arith.constant 0 : index
    %c0_10 = arith.constant 0 : index
    %11 = vector.load %arg2[%c1, %c0_9, %c0_10] : memref<2x8x32xf32, #tpu.memory_space<vmem>>, vector<1x8x32xf32>
    %12 = vector.shape_cast %11 : vector<1x8x32xf32> to vector<8x32xf32>
    %c1_11 = arith.constant 1 : index
    %c0_12 = arith.constant 0 : index
    %c0_13 = arith.constant 0 : index
    %13 = vector.load %arg1[%c1_11, %c0_12, %c0_13] : memref<2x32x16xf32, #tpu.memory_space<vmem>>, vector<1x32x16xf32>
    %14 = vector.shape_cast %13 : vector<1x32x16xf32> to vector<32x16xf32>
    %cst_14 = arith.constant dense<0.000000e+00> : vector<8x16xf32>
    %15 = tpu.matmul %12, %14, %cst_14 {dimension_numbers = #tpu.dot_dimension_numbers<[1], [0], [0], [1], [0, 0, 1, 1], [], []>} : vector<8x32xf32>, vector<32x16xf32>, vector<8x16xf32> -> vector<8x16xf32>
    %cst_15 = arith.constant 0.000000e+00 : f32
    %16 = vector.broadcast %cst_15 : f32 to vector<8x16xf32>
    %17 = arith.maximumf %15, %16 : vector<8x16xf32>
    %c1_16 = arith.constant 1 : index
    %c0_17 = arith.constant 0 : index
    %c0_18 = arith.constant 0 : index
    %18 = vector.load %arg3[%c1_16, %c0_17, %c0_18] : memref<2x8x1xf32, #tpu.memory_space<vmem>>, vector<1x8x1xf32>
    %19 = vector.shape_cast %18 : vector<1x8x1xf32> to vector<8x1xf32>
    %20 = vector.broadcast %19 : vector<8x1xf32> to vector<8x16xf32>
    %21 = arith.mulf %17, %20 : vector<8x16xf32>
    %22 = arith.mulf %10, %21 : vector<8x16xf32>
    %c0_19 = arith.constant 0 : index
    %c0_20 = arith.constant 0 : index
    %23 = vector.load %arg4[%c0_19, %c0_20] : memref<8x1xf32, #tpu.memory_space<vmem>>, vector<8x1xf32>
    %24 = vector.broadcast %23 : vector<8x1xf32> to vector<8x16xf32>
    %25 = arith.mulf %22, %24 : vector<8x16xf32>
    %cst_21 = arith.constant dense<0.000000e+00> : vector<16xf32>
    %26 = vector.multi_reduction <add>, %25, %cst_21 [0] : vector<8x16xf32> to vector<16xf32>
    %27 = vector.shape_cast %26 : vector<16xf32> to vector<1x16xf32>
    %c0_22 = arith.constant 0 : index
    %c0_23 = arith.constant 0 : index
    %28 = vector.load %arg5[%c0_22, %c0_23] : memref<1x16xf32, #tpu.memory_space<vmem>>, vector<1x16xf32>
    tpu.vector_store %arg5[%c0_22, %c0_23], %27 {strides = array<i32>} : memref<1x16xf32, #tpu.memory_space<vmem>>, vector<1x16xf32>,
    return
  }
  func.func @transform_0(%arg0: i32) -> (i32, i32, i32) {
    %c0_i32 = arith.constant 0 : i32
    %c0_i32_0 = arith.constant 0 : i32
    %c0_i32_1 = arith.constant 0 : i32
    return %c0_i32, %c0_i32_0, %arg0 : i32, i32, i32
  }
  func.func @transform_1(%arg0: i32) -> (i32, i32, i32) {
    %c0_i32 = arith.constant 0 : i32
    %c0_i32_0 = arith.constant 0 : i32
    %c0_i32_1 = arith.constant 0 : i32
    %c0_i32_2 = arith.constant 0 : i32
    return %c0_i32, %c0_i32_0, %c0_i32_1 : i32, i32, i32
  }
  func.func @transform_2(%arg0: i32) -> (i32, i32, i32) {
    %c0_i32 = arith.constant 0 : i32
    %c0_i32_0 = arith.constant 0 : i32
    %c0_i32_1 = arith.constant 0 : i32
    %c0_i32_2 = arith.constant 0 : i32
    return %c0_i32, %c0_i32_0, %c0_i32_1 : i32, i32, i32
  }
  func.func @transform_3(%arg0: i32) -> (i32, i32) {
    %c0_i32 = arith.constant 0 : i32
    %c0_i32_0 = arith.constant 0 : i32
    %c0_i32_1 = arith.constant 0 : i32
    return %c0_i32, %c0_i32_0 : i32, i32
  }
  func.func @transform_4(%arg0: i32) -> (i32, i32) {
    %c0_i32 = arith.constant 0 : i32
    %c0_i32_0 = arith.constant 0 : i32
    return %c0_i32, %arg0 : i32, i32
  }
}

</mosaic_0001>

<bundles_post_ra>
// kernel: tpu_custom_call.1
= control target key start
LH: loop header
LB: loop body
LE: loop exit
PB: predicated region body
PF: predicated region fallthrough
CT: control target
= control target key end

     0   :  { %v166_v5 = vmov 0   ;;  %s235_s0 = inlined_call_operand.vmem [shape: f32[2,32,16], index: 0, kind: input, shape index: {}]   ;;  %s236_s1 = inlined_call_operand.vmem [shape: f32[2,8,32], index: 1, kind: input, shape index: {}]   ;;  %s237_s2 = inlined_call_operand.vmem [shape: f32[2,8,1], index: 2, kind: input, shape index: {}]   ;;  %s238_s3 = inlined_call_operand.vmem [shape: f32[8,1], index: 3, kind: input, shape index: {}]   ;;  %s239_s4 = inlined_call_operand.hbm [shape: f32[1,16], index: 4, kind: output, shape index: {}]  }
   0x1   :  { %v22_v0 = vld [vmem:[%s235_s0 + $0x18] sm:$0xff]  ;;  %v21_v2 = vld [vmem:[%s235_s0 + $0x10] sm:$0xff]  ;;  %v48_v4 = vld [vmem:[%s237_s2] sm:$0xff]  ;;  %138 = vset.pattern.permute.xlu0 %v166_v5  ;;  %139 = vset.pattern.permute.xlu1 %v166_v5 }
   0x2   :  { %v133_v1 = vld [vmem:[%s235_s0 + $0x38] sm:$0xff]  ;;  %39 = vmatpush.msra.mxu0 %v22_v0  ;;  %v132_v3 = vld [vmem:[%s235_s0 + $0x30] sm:$0xff]  ;;  %v131_v6 = vld [vmem:[%s235_s0 + $0x28] sm:$0xff]  ;;  %51 = vperm.xlu0 %138, %v48_v4  }
   0x3   :  { %77 = vmatpush.msra.mxu1 %v133_v1  ;;  %v20_v7 = vld [vmem:[%s235_s0 + $0x8] sm:$0xff]  ;;  %v19_v8 = vld [vmem:[%s235_s0] sm:$0xff] }
   0x4   :  { %40 = vmatpush.msra.mxu0 %v21_v2  ;;  %v130_v9 = vld [vmem:[%s235_s0 + $0x20] sm:$0xff] }
   0x5   :  { %78 = vmatpush.msra.mxu1 %v132_v3  ;;  %v95_v10 = vld [vmem:[%s238_s3] sm:$0xff] }
   0x6   :  { %9 = vsyncpa [#allocation3], 0  ;;  %41 = vmatpush.msra.mxu0 %v20_v7  ;;  %v18_v11 = vld [vmem:[%s236_s1] sm:$0xff]  ;;  %vm23_vm0 = vcmask 261120   ;;  %v129_v12 = vld [vmem:[%s236_s1 + $0x8] sm:$0xff]  ;;  %98 = vperm.xlu1 %139, %v95_v10   ;;  %vm102_vm1 = vcmask 130048  }
   0x7   :  { %79 = vmatpush.msra.mxu1 %v131_v6  ;;  %v135_v13 = vld [vmem:[%s237_s2 + $0x8] sm:$0xff]  ;;  %s167_s1 = smov [#allocation2]   ;;  %s119_s15 = sshll.u32 %s239_s4, 4  ;;  %vm110_vm2 = vcmask 122880   ;;  %s120_s15 = int_to_ptr.hbm [resolvable:$true] %s119_s15 }
   0x8   :  { %42 = vmatpush.msra.mxu0 %v19_v8  ;;  %s117_s2 = sshll.u32 %s167_s1, 4  ;;  %s118_s2 = int_to_ptr.vmem [resolvable:$true] %s117_s2 }
   0x9   :  { %80 = vmatpush.msra.mxu1 %v130_v9  ;;  %128 = vmatmul.msk.f32.vlgmr.msra.gmra.mxu0 %vm23_vm0, %v18_v11 }
   0xa   :  { %134 = vmatmul.msk.f32.vlgmr.msra.gmra.mxu1 %vm23_vm0, %v129_v12  ;;  %90 = vperm.xlu0 %138, %v135_v13  }
  0x74   :  { %v52_v14 = vpop.permute.xlu0 %51 }
  0x78   :  { %v99_v22 = vpop.permute.xlu1 %98 }
  0x7c   :  { %v91_v19 = vpop.permute.xlu0 %90 }
  0x86   :  { %v44_v15 = vpop.f32.mrf.mxu0 }
  0x87   :  { %v82_v16 = vpop.f32.mrf.mxu1  ;;  %v47_v17 = vmax.f32 %v44_v15, 0.0 }
  0x88   :  { %v85_v18 = vmax.f32 %v82_v16, 0.0 }
  0x89   :  { %v54_v20 = vmul.f32 %v52_v14, %v47_v17 }
  0x8a   :  { %v93_v21 = vmul.f32 %v91_v19, %v85_v18 }
  0x8c   :  { %v94_v23 = vmul.f32 %v93_v21, %v54_v20 }
  0x8e   :  { %v101_v24 = vmul.f32 %v99_v22, %v94_v23 }
  0x90   :  { %v103_v25 = vsel %vm102_vm1, %v101_v24, 0.0 }
  0x91   :  { %v104_v26 = vrot.slane %v103_v25, 4 }
  0x93   :  { %v105_v27 = vadd.f32 %v104_v26, %v103_v25 }
  0x95   :  { %v106_v28 = vrot.slane %v105_v27, 2 }
  0x97   :  { %v107_v29 = vadd.f32 %v106_v28, %v105_v27 }
  0x99   :  { %v108_v30 = vrot.slane %v107_v29, 1 }
  0x9b   :  { %v109_v31 = vadd.f32 %v108_v30, %v107_v29 }
  0x9d   :  { %111 = vst.msk [vmem:[#allocation2] sm:$0x1] %vm110_vm2, %v109_v31 }
  0x9e   :  { %122 = dma.vmem_to_hbm [thread:$0]  %s118_s2, 16, %s120_s15, [#allocation3]  }
  0x9f   :  { %164 = dma.done.wait [#allocation3], 16  }
  0xa0   :  { %165 = vsyncadd [#allocation3], 4294967280 }
  0xa1   :  { %127 = vsyncpa [#allocation3], 1 }

</bundles_post_ra>
